<compile_context>
chip_gen: v6e
topology: v6e:2x2x1
jax: 0.10.0
libtpu: 0.0.40
codegen_flags: <defaults>
</compile_context>

<pallas_src>
import functools

import jax
import jax.numpy as jnp
import numpy as np
from jax.experimental import pallas as pl
from jax.experimental.pallas import tpu as pltpu


def _round_up(v, m):
    return (v + m - 1) // m * m


# ---------------------------------------------------------------------------
# Deterministic parameter init: he_orthogonal_init equivalent in JAX.
# ---------------------------------------------------------------------------
def _standardize(kernel):
    # 2-D case of the PyTorch _standardize: mean/var over dim=1 (unbiased).
    mean = jnp.mean(kernel, axis=1, keepdims=True)
    var = jnp.var(kernel, axis=1, ddof=1, keepdims=True)
    return (kernel - mean) / jnp.sqrt(var + 1e-6)


def he_orthogonal_init(key, out_features, in_features, dtype=jnp.float32):
    w = jax.random.orthogonal(key, n=max(out_features, in_features), dtype=dtype)
    w = w[:out_features, :in_features]
    w = _standardize(w)
    return w * (1.0 / in_features) ** 0.5


def prepare_residual_weights(weights, matmul_dtype=jnp.bfloat16):
    """One-time parameter prep (kept OUT of the jitted hot path).

    `weights` are PyTorch-layout (out_features, in_features) matrices.
    Returns (in_features, out_features)-layout copies cast to `matmul_dtype`,
    so the kernel never transposes or re-casts weights per call.

    bfloat16 operands (with f32 accumulation in-kernel) are the recommended
    default on v5e / v6e / v7x; use float32 only if bit-parity with the
    PyTorch f32 path is required.
    """
    return tuple(jnp.asarray(w).T.astype(matmul_dtype) for w in weights)


# ---------------------------------------------------------------------------
# Pallas kernel: fused residual MLP (nLayers dense + SiLU, then residual add).
# Refs: (x_tile, W1^T, ..., Wn^T, out_tile).  Weights already at matmul_dtype.
# ---------------------------------------------------------------------------
def _residual_mlp_kernel(*refs, matmul_dtype, approx_silu):
    x_ref, *w_refs, o_ref = refs
    x = x_ref[...]

    h_f32 = None
    for idx, w_ref in enumerate(w_refs):
        lhs = x.astype(matmul_dtype) if idx == 0 else h_f32.astype(matmul_dtype)
        # MXU matmul: operands at matmul_dtype, f32 accumulation.
        acc = jnp.dot(lhs, w_ref[...], preferred_element_type=jnp.float32)
        if approx_silu:
            # exp on EUP, approximate reciprocal on EUP (vrcp) -> frees VALU.
            h_f32 = acc * pl.reciprocal(1.0 + jnp.exp(-acc), approx=True)
        else:
            # Exact SiLU for the f32 bit-parity path.
            h_f32 = acc * jax.nn.sigmoid(acc)

    # Residual add in f32 (no 1/sqrt(2) scaling: matches reference forward()).
    o_ref[...] = (x.astype(jnp.float32) + h_f32).astype(o_ref.dtype)


# ---------------------------------------------------------------------------
# Wrapper: row-tiled, pipelined pallas_call.  Handles ragged N in-kernel
# (partial last tile is masked by the Pallas pipeline) -- no pad/slice copies.
# ---------------------------------------------------------------------------
@functools.partial(jax.jit, static_argnames=("tile_n", "core_parallel"))
def residual_layer(x, weights_t, *, tile_n=4096, core_parallel=False):
    """Fused ResidualLayer forward.

    x:         (N, units), f32 or bf16.  Output dtype follows x (carrying
               activations in bf16 halves the HBM-bound x/out traffic).
    weights_t: tuple of (units, units) weights in (in, out) layout at the
               desired matmul operand dtype (see prepare_residual_weights).
    tile_n:    row tile; large by default to amortize per-grid-step overhead.
    core_parallel: on v7x, shard row tiles across both TensorCores.
    """
    n, units = x.shape
    n_layers = len(weights_t)
    assert n_layers >= 1
    for w in weights_t:
        assert w.shape == (units, units)

    matmul_dtype = weights_t[0].dtype
    out_dtype = x.dtype
    approx_silu = jnp.dtype(matmul_dtype) != jnp.dtype(jnp.float32)

    # Row tile: multiple of 8 sublanes, capped so the estimated working set
    # (double-buffered x/out + resident weights + f32 temps) stays <= ~40 MiB.
    act_b = jnp.dtype(x.dtype).itemsize
    out_b = jnp.dtype(out_dtype).itemsize
    w_b = jnp.dtype(matmul_dtype).itemsize
    weight_vmem = 2 * n_layers * units * units * w_b        # double-buffered default
    per_row = units * (2 * act_b + 2 * out_b + 4 * 4)       # x, out (x2), f32 temps
    max_tn = max(8, int(((40 << 20) - weight_vmem) // per_row) // 8 * 8)
    tn = min(int(tile_n), _round_up(n, 8), max_tn)
    tn = max(8, (tn // 8) * 8)
    grid = (pl.cdiv(n, tn),)

    est = tn * per_row + weight_vmem
    vmem_limit = int(min(max(2 * est, 32 << 20), 48 << 20))  # 48 MiB: v7x headroom

    # Activation tile streams with the grid; constant index_maps keep the
    # (pre-transposed, pre-cast) weights VMEM-resident across grid steps.
    in_specs = [pl.BlockSpec((tn, units), lambda i: (i, 0))]
    in_specs += [pl.BlockSpec((units, units), lambda i: (0, 0))
                 for _ in range(n_layers)]

    dim_sem = (pltpu.CORE_PARALLEL,) if core_parallel else (pltpu.PARALLEL,)

    return pl.pallas_call(
        functools.partial(_residual_mlp_kernel,
                          matmul_dtype=matmul_dtype, approx_silu=approx_silu),
        out_shape=jax.ShapeDtypeStruct((n, units), out_dtype),
        grid=grid,
        in_specs=in_specs,
        out_specs=pl.BlockSpec((tn, units), lambda i: (i, 0)),
        compiler_params=pltpu.CompilerParams(
            dimension_semantics=dim_sem,
            vmem_limit_bytes=vmem_limit,
        ),
    )(x, *weights_t)


# ---------------------------------------------------------------------------
# Host-side float64 reference (unambiguous ground truth, mirrors PyTorch).
# Weights here are in PyTorch (out, in) layout.
# ---------------------------------------------------------------------------
def residual_layer_ref_f64(x64, weights64):
    h = x64
    for w in weights64:
        z = h @ w.T
        h = z / (1.0 + np.exp(-z))          # silu(z) = z * sigmoid(z)
    return x64 + h


if __name__ == "__main__":
    key = jax.random.PRNGKey(0)
    k_x, k_w1, k_w2 = jax.random.split(key, 3)

    units = 128     # lane-dense feature dim -> unmasked stores, full MXU rows
    n_rows = 200    # NOT a tile multiple -> exercises in-kernel ragged masking

    x = jax.random.normal(k_x, (n_rows, units), dtype=jnp.float32)
    w1 = he_orthogonal_init(k_w1, units, units)   # PyTorch (out, in) layout
    w2 = he_orthogonal_init(k_w2, units, units)

    ref = residual_layer_ref_f64(
        np.asarray(x, np.float64),
        [np.asarray(w, np.float64) for w in (w1, w2)])

    # --- Path 1: f32 operands (bit-parity oriented).  tile_n=64 here only to
    #     force a multi-step pipelined grid with a ragged last tile on this
    #     tiny demo; the production default is tile_n=4096.
    wt_f32 = prepare_residual_weights((w1, w2), jnp.float32)
    out_f32 = jax.block_until_ready(residual_layer(x, wt_f32, tile_n=64))
    assert out_f32.shape == (n_rows, units) and out_f32.dtype == jnp.float32
    err_f32 = float(np.max(np.abs(np.asarray(out_f32, np.float64) - ref)))
    # Tolerance covers possible reduced-precision f32 MXU modes; semantic bugs
    # (missing residual, wrong transpose, extra 1/sqrt(2)) would be O(1).
    assert err_f32 < 5e-2, f"f32 path max error {err_f32}"

    # --- Path 2 (recommended on v5e/v6e/v7x): bf16 activations + bf16 matmul
    #     operands, f32 accumulation/SiLU in-kernel, bf16 output.
    wt_bf16 = prepare_residual_weights((w1, w2), jnp.bfloat16)
    x_bf16 = x.astype(jnp.bfloat16)
    out_bf16 = jax.block_until_ready(residual_layer(x_bf16, wt_bf16))
    assert out_bf16.shape == (n_rows, units) and out_bf16.dtype == jnp.bfloat16
    err_bf16 = float(np.max(np.abs(
        np.asarray(out_bf16.astype(jnp.float32), np.float64) - ref)))
    assert err_bf16 < 1.5e-1, f"bf16 path max error {err_bf16}"

    print("KERNEL_OK")
</pallas_src>

<mosaic_0001>
module attributes {stable_mosaic.version = 11 : i64} {
  func.func @_residual_mlp_kernel(%arg0: i32, %arg1: memref<64x128xf32, #tpu.memory_space<vmem>>, %arg2: memref<128x128xf32, #tpu.memory_space<vmem>>, %arg3: memref<128x128xf32, #tpu.memory_space<vmem>>, %arg4: memref<64x128xf32, #tpu.memory_space<vmem>>) attributes {dimension_semantics = [#tpu.dimension_semantics<parallel>], iteration_bounds = array<i64: 4>, scalar_prefetch = 0 : i64, scratch_operands = 0 : i64, tpu.core_type = #tpu.core_type<tc>, window_params = [{transform_indices = @transform_0, window_bounds = array<i64: 64, 128>}, {pipeline_mode = #tpu.pipeline_mode<synchronous>, transform_indices = @transform_1, window_bounds = array<i64: 128, 128>}, {pipeline_mode = #tpu.pipeline_mode<synchronous>, transform_indices = @transform_2, window_bounds = array<i64: 128, 128>}, {transform_indices = @transform_3, window_bounds = array<i64: 64, 128>}]} {
    %c0 = arith.constant 0 : index
    %c0_0 = arith.constant 0 : index
    %0 = vector.load %arg1[%c0, %c0_0] : memref<64x128xf32, #tpu.memory_space<vmem>>, vector<64x128xf32>
    %c0_1 = arith.constant 0 : index
    %c0_2 = arith.constant 0 : index
    %1 = vector.load %arg2[%c0_1, %c0_2] : memref<128x128xf32, #tpu.memory_space<vmem>>, vector<128x128xf32>
    %cst = arith.constant dense<0.000000e+00> : vector<64x128xf32>
    %2 = tpu.matmul %0, %1, %cst {dimension_numbers = #tpu.dot_dimension_numbers<[1], [0], [0], [1], [0, 0, 1, 1], [], []>} : vector<64x128xf32>, vector<128x128xf32>, vector<64x128xf32> -> vector<64x128xf32>
    %3 = arith.negf %2 : vector<64x128xf32>
    %4 = math.exp %3 : vector<64x128xf32>
    %cst_3 = arith.constant 1.000000e+00 : f32
    %5 = vector.broadcast %cst_3 : f32 to vector<64x128xf32>
    %6 = arith.addf %5, %4 : vector<64x128xf32>
    %7 = arith.divf %5, %6 : vector<64x128xf32>
    %8 = arith.mulf %2, %7 : vector<64x128xf32>
    %c0_4 = arith.constant 0 : index
    %c0_5 = arith.constant 0 : index
    %9 = vector.load %arg3[%c0_4, %c0_5] : memref<128x128xf32, #tpu.memory_space<vmem>>, vector<128x128xf32>
    %cst_6 = arith.constant dense<0.000000e+00> : vector<64x128xf32>
    %10 = tpu.matmul %8, %9, %cst_6 {dimension_numbers = #tpu.dot_dimension_numbers<[1], [0], [0], [1], [0, 0, 1, 1], [], []>} : vector<64x128xf32>, vector<128x128xf32>, vector<64x128xf32> -> vector<64x128xf32>
    %11 = arith.negf %10 : vector<64x128xf32>
    %12 = math.exp %11 : vector<64x128xf32>
    %cst_7 = arith.constant 1.000000e+00 : f32
    %13 = vector.broadcast %cst_7 : f32 to vector<64x128xf32>
    %14 = arith.addf %13, %12 : vector<64x128xf32>
    %15 = arith.divf %13, %14 : vector<64x128xf32>
    %16 = arith.mulf %10, %15 : vector<64x128xf32>
    %17 = arith.addf %0, %16 : vector<64x128xf32>
    %c0_8 = arith.constant 0 : index
    %c0_9 = arith.constant 0 : index
    %18 = vector.load %arg4[%c0_8, %c0_9] : memref<64x128xf32, #tpu.memory_space<vmem>>, vector<64x128xf32>
    tpu.vector_store %arg4[%c0_8, %c0_9], %17 {strides = array<i32>} : memref<64x128xf32, #tpu.memory_space<vmem>>, vector<64x128xf32>,
    return
  }
  func.func @transform_0(%arg0: i32) -> (i32, i32) {
    %c0_i32 = arith.constant 0 : i32
    %c0_i32_0 = arith.constant 0 : i32
    return %arg0, %c0_i32 : i32, i32
  }
  func.func @transform_1(%arg0: i32) -> (i32, i32) {
    %c0_i32 = arith.constant 0 : i32
    %c0_i32_0 = arith.constant 0 : i32
    %c0_i32_1 = arith.constant 0 : i32
    return %c0_i32, %c0_i32_0 : i32, i32
  }
  func.func @transform_2(%arg0: i32) -> (i32, i32) {
    %c0_i32 = arith.constant 0 : i32
    %c0_i32_0 = arith.constant 0 : i32
    %c0_i32_1 = arith.constant 0 : i32
    return %c0_i32, %c0_i32_0 : i32, i32
  }
  func.func @transform_3(%arg0: i32) -> (i32, i32) {
    %c0_i32 = arith.constant 0 : i32
    %c0_i32_0 = arith.constant 0 : i32
    return %arg0, %c0_i32 : i32, i32
  }
}

</mosaic_0001>

<bundles_post_ra>
// kernel: residual_layer.1
= control target key start
LH: loop header
LB: loop body
LE: loop exit
PB: predicated region body
PF: predicated region fallthrough
CT: control target
= control target key end

     0   :  { %8 = vsyncpa [#allocation3], 0  ;;  %s1478_s0 = inlined_call_operand.hbm [shape: f32[200,128], index: 0, kind: input, shape index: {}]   ;;  %s1479_s1 = inlined_call_operand.hbm [shape: f32[128,128], index: 1, kind: input, shape index: {}]   ;;  %s1480_s2 = inlined_call_operand.hbm [shape: f32[128,128], index: 2, kind: input, shape index: {}]   ;;  %s1481_s3 = inlined_call_operand.hbm [shape: f32[200,128], index: 3, kind: output, shape index: {}]  }
   0x1   :  { %10 = vsyncpa [#allocation3 + $0x1], 0 }
   0x2   :  { %11 = vsyncpa [#allocation6], 0 }
   0x3   :  { %12 = vsyncpa [#allocation4], 0 }
   0x4   :  { %14 = vsyncpa [#allocation4 + $0x1], 0  ;;  %s1212_s12 = smov 0   ;;  %s1214_s13 = smov 0  }
   0x5   :  { %s1216_s14 = smov 0   ;;  %s1218_s15 = smov 0  }
   0x6 LB: > { %s1233_s16 = sadd.s32 4294967295, %s1180_s15   ;;  %s724_s17 = sadd.s32 4294967294, %s1180_s15   ;;  %s1180_s15 = sphi %s1218_s15, %s1498_s15   ;;  %s1176_s14 = sphi %s1216_s14, %s1497_s14   ;;  %s1172_s13 = sphi %s1214_s13, %s1496_s13   ;;  %s1168_s12 = sphi %s1212_s12, %s1495_s12  }
   0x7   : > { %s1237_s18 = sadd.s32 1, %s1180_s15   ;;  %s27_s19 = sadd.s32 1, %s1176_s14 }
   0x8   : > { %s24_s20 = ssub.s32 %s1180_s15, %s1237_s18  ;;  %p34_p0 = scmp.ne.s32.totalorder %s1176_s14, %s1172_s13 }
   0x9   : > { %p25_p1 = scmp.eq.s32.totalorder %s24_s20, 0  ;;  %p35_p2 = scmp.eq.s32.totalorder %s1180_s15, 0 }
   0xa   : > { %p40_p3 = scmp.ne.s32.totalorder %s1172_s13, %s1168_s12  ;;  %p1482_p4 = scmp.eq.s32.totalorder %s1233_s16, 0 }
   0xb   : > { %s1249_s21 = scalar_select %p25_p1, %s1176_s14, %s27_s19  }
   0xc   : > { %p1251_p5 = por %p35_p2, %p34_p0  ;;  %p1257_p6 = por %p1482_p4, %p40_p3 }
   0xd   : > { %p106_p7 = scmp.eq.s32.totalorder %s1233_s16, 3  ;;  %p112_p8 = scmp.eq.s32.totalorder %s724_s17, 3 }
   0xe   : > { %s1485_s23 = scalar_select %p1257_p6, 1, 0 }
   0xf   : > { %p725_p9 = scmp.ge.s32.totalorder %s1180_s15, 1  ;;  %p119_p10 = scmp.lt.s32.totalorder %s1180_s15, 5 }
  0x10   : > { %p1264_p11 = por %p106_p7, %p34_p0  ;;  %p1268_p12 = por %p112_p8, %p40_p3 }
  0x11   : > { %p1272_p13 = pnand %p725_p9, %p119_p10  ;;  %s1182_s27 = smov [#allocation5]  }
  0x12   : > { %s1486_s24 = scalar_select %p1264_p11, 1, 0 }
  0x13   : > { %s1487_s25 = scalar_select %p1268_p12, 1, 0 }
  0x14   : > { %p914_p1 = pneg %p1272_p13  ;;  %s131_s28 = sshll.u32 %s1182_s27, 4  ;;  %s132_s28 = int_to_ptr.vmem [resolvable:$true] %s131_s28 }
  0x15   : > { %s1183_s30 = smov [#allocation7]   ;;  %s1045_s5 = scalar_lea.vmem %s132_s28, 2048 }
  0x16   : > { %p1280_p2 = pnand %p914_p1, %p1482_p4  ;;  %s144_s4 = sshll.u32 %s1183_s30, 4  ;;  %s145_s4 = int_to_ptr.vmem [resolvable:$true] %s144_s4 }
  0x17   : > { %p1046_p3 = scmp.ne.s32.totalorder %s132_s28, %s1045_s5  ;;  %p1053_p9 = scmp.lt.s32.totalorder %s132_s28, %s132_s28 }
  0x18   : > { %p1036_p0 = pneg %p1280_p2  ;;  %p1054_p10 = scmp.lt.s32.totalorder %s1045_s5, %s1045_s5 }
  0x1a   : > { %p1048_p7 = pnand %p1046_p3, %p1036_p0  ;;  %p1055_p12 = por %p1054_p10, %p1053_p9 }
  0x1c   : > { %p1049_p8 = pneg %p1048_p7 }
  0x1e   : > { %p1056_p1 = pnand %p1055_p12, %p1049_p8 }
  0x20   : > { %1059 = shalt.err (!%p1056_p1)
}
  0x21   : > { %s1184_s6 = smov 128   ;;  %s1185_s7 = smov 8  }
  0x22   : > { %917 = dma.hbm_to_vmem [thread:$0]  (!%p1280_p2), %s1479_s1, 2048, %s132_s28, [#allocation6], %s1184_s6, %s1184_s6, %s1185_s7  }
  0x23   : > { %s1071_s10 = scalar_lea.vmem %s145_s4, 2048  ;;  %p1079_p11 = scmp.lt.s32.totalorder %s145_s4, %s145_s4 }
  0x24   : > { %p1072_p4 = scmp.ne.s32.totalorder %s145_s4, %s1071_s10  ;;  %p1080_p6 = scmp.lt.s32.totalorder %s1071_s10, %s1071_s10 }
  0x26   : > { %p1074_p3 = pnand %p1072_p4, %p1036_p0  ;;  %p1081_p9 = por %p1080_p6, %p1079_p11 }
  0x28   : > { %p1075_p7 = pneg %p1074_p3 }
  0x2a   : > { %p1082_p12 = pnand %p1081_p9, %p1075_p7 }
  0x2c   : > { %1085 = shalt.err (!%p1082_p12)
}
  0x2d   : > { %920 = dma.hbm_to_vmem [thread:$0]  (!%p1280_p2), %s1480_s2, 2048, %s145_s4, [#allocation6], %s1184_s6, %s1184_s6, %s1185_s7  }
  0x2e   : > { %p728_p8 = scmp.ge.s32.totalorder %s1180_s15, 4 }
  0x30   : > { %154 = sbr.rel (%p728_p8) target bundleno = 85 (0x55), region = 24 }
  0x35   : > { %157 = sbr.rel (!%p1251_p5) target bundleno = 85 (0x55), region = 28  ;;  %s158_s19 = sand.u32 (%p1251_p5), 1, %s1176_s14  }
  0x36   : > { %s730_s20 = sshll.u32 (%p1251_p5), %s1180_s15, 3  ;;  %s729_s27 = sshll.u32 (%p1251_p5), %s158_s19, 6 }
  0x37   : > { %s164_s28 = ssub.s32 (%p1251_p5), 25, %s730_s20  ;;  %s1310_s5 = scalar_lea.sflag (%p1251_p5), [#allocation3], %s158_s19 }
  0x38   : > { %p165_p4 = scmp.lt.s32.totalorder (%p1251_p5), %s164_s28, 8  ;;  %s162_s4 = scalar_lea.vmem (%p1251_p5), [#allocation2], %s729_s27 }
  0x3a   : > { %s1500_s28 = smov (!%p165_p4, %s164_s28), 8 }
  0x3b   : > { %s1307_s30 = sshll.u32 %s1500_s28, 7 }
  0x3c   : > { %s169_s29 = ssub.s32 1024, %s1307_s30 }
  0x3d   : > { %170 = vsyncadd %s1310_s5, %s169_s29  ;;  %p732_p5 = scmp.ne.s32.totalorder %s1307_s30, 0  ;;  %s766_s22 = sshll.u32 %s1180_s15, 10 }
  0x3e   : > { %s1318_s8 = scalar_lea.hbm %s1478_s0, %s766_s22  ;;  %s175_s9 = sshll.u32 %s162_s4, 4  ;;  %s1320_s9 = int_to_ptr.vmem [resolvable:$true] %s175_s9 }
  0x3f   : > { %s1086_s10 = scalar_lea.hbm %s1318_s8, %s1307_s30  ;;  %s1090_s19 = scalar_lea.hbm %s1478_s0, 3200 }
  0x40   : > { %p1087_p6 = scmp.ne.s32.totalorder %s1318_s8, %s1086_s10  ;;  %p1091_p0 = scmp.lt.s32.totalorder %s1318_s8, %s1478_s0 }
  0x41   : > { %p1092_p10 = scmp.lt.s32.totalorder %s1090_s19, %s1086_s10 }
  0x42   : > { %p1088_p11 = pnand %p1087_p6, %p732_p5 }
  0x43   : > { %p1093_p1 = por %p1092_p10, %p1091_p0 }
  0x44   : > { %p1089_p2 = pneg %p1088_p11 }
  0x46   : > { %p1094_p3 = pnand %p1093_p1, %p1089_p2 }
  0x48   : > { %1097 = shalt.err (!%p1094_p3)
}
  0x49   : > { %s1098_s28 = scalar_lea.vmem %s1320_s9, %s1307_s30  ;;  %s1186_s29 = smov [#allocation2]  }
  0x4a   : > { %p1099_p7 = scmp.ne.s32.totalorder %s1320_s9, %s1098_s28  ;;  %s1102_s4 = sshll.u32 %s1186_s29, 4  ;;  %s1103_s4 = int_to_ptr.vmem [resolvable:$false] %s1102_s4 }
  0x4b   : > { %s1104_s22 = scalar_lea.vmem %s1103_s4, 2048  ;;  %p1105_p8 = scmp.lt.s32.totalorder %s1320_s9, %s1103_s4 }
  0x4c   : > { %p1100_p9 = pnand %p1099_p7, %p732_p5  ;;  %p1106_p4 = scmp.lt.s32.totalorder %s1104_s22, %s1098_s28 }
  0x4e   : > { %p1101_p12 = pneg %p1100_p9  ;;  %p1107_p6 = por %p1106_p4, %p1105_p8 }
  0x50   : > { %p1108_p11 = pnand %p1107_p6, %p1101_p12 }
  0x52   : > { %1111 = shalt.err (!%p1108_p11)
}
  0x53   : > { %s1187_s6 = smov 128   ;;  %s1188_s7 = smov 8  }
  0x54   : > { %181 = dma.hbm_to_vmem [thread:$0]  (%p732_p5), %s1318_s8, %s1307_s30, %s1320_s9, %s1310_s5, %s1187_s6, %s1187_s6, %s1188_s7  }
  0x55 PF: > { %187 = sbr.rel (%p1272_p13) target bundleno = 628 (0x274), region = 32  ;;  %s1349_s10 = sand.u32 (!%p1272_p13), 1, %s1172_s13  }
  0x56   : > { %s737_s11 = sshll.u32 (!%p1272_p13), %s1349_s10, 6  ;;  %s190_s17 = scalar_lea.sflag (!%p1272_p13), [#allocation3], %s1349_s10 }
  0x57   : > { %s1355_s19 = scalar_lea.vmem (!%p1272_p13), [#allocation2], %s737_s11  ;;  %p1490_p2 = scmp.ne.s32.totalorder (!%p1272_p13), %s1485_s23, 0 }
  0x5a   : > { %1155 = dma.done.wait (%p1490_p2), %s190_s17, 1024  }
  0x5b   : > { %1157 = vsyncadd (%p1490_p2), %s190_s17, 4294966272  ;;  %p1491_p5 = scmp.eq.s32.totalorder %s1233_s16, 0 }
  0x5d   : > { %1159 = dma.done.wait (%p1491_p5), [#allocation6], 4096   ;;  %p1492_p13 = pmov %p1491_p5 }
  0x5e   : > { %v257_v0 = vld [vmem:[#allocation5 + $0x78] sm:$0xff]  ;;  %v256_v1 = vld [vmem:[#allocation5 + $0x70] sm:$0xff]  ;;  %v255_v2 = vld [vmem:[#allocation5 + $0x68] sm:$0xff]  ;;  %s1400_s23 = scalar_lea.vmem [#allocation8], %s737_s11  ;;  %s613_s26 = scalar_lea.sflag [#allocation4], %s1349_s10 }
  0x5f   : > { %1161 = vsyncadd (%p1492_p13), [#allocation6], 4294963200  ;;  %816 = vmatprep.subr.mxu0 %v257_v0  ;;  %v254_v3 = vld [vmem:[#allocation5 + $0x60] sm:$0xff]  ;;  %v253_v5 = vld [vmem:[#allocation5 + $0x58] sm:$0xff]  ;;  %p1493_p0 = scmp.ne.s32.totalorder %s1486_s24, 0 }
  0x60   : > { %817 = vmatpush3.msra.mxu0 %v257_v0  ;;  %v1366_v4 = vld [vmem:[%s1355_s19] sm:$0xff]  ;;  %v252_v6 = vld [vmem:[#allocation5 + $0x50] sm:$0xff]  ;;  %v251_v7 = vld [vmem:[#allocation5 + $0x48] sm:$0xff]  ;;  %s758_s30 = sshll.u32 (%p1493_p0), %s1233_s16, 3 }
  0x61   : > { %818 = vmatprep.subr.mxu0 %v256_v1  ;;  %848 = vmatprep.mubr.f32.mxu0 %v1366_v4  ;;  %v250_v8 = vld [vmem:[#allocation5 + $0x40] sm:$0xff]  ;;  %v249_v9 = vld [vmem:[#allocation5 + $0x38] sm:$0xff]  ;;  %v248_v10 = vld [vmem:[#allocation5 + $0x30] sm:$0xff]  ;;  %s621_s5 = ssub.s32 (%p1493_p0), 25, %s758_s30 }
  0x62   : > { %819 = vmatpush3.msra.mxu0 %v256_v1  ;;  %v247_v11 = vld [vmem:[#allocation5 + $0x28] sm:$0xff]  ;;  %v246_v12 = vld [vmem:[#allocation5 + $0x20] sm:$0xff]  ;;  %v245_v13 = vld [vmem:[#allocation5 + $0x18] sm:$0xff]  ;;  %p622_p10 = scmp.lt.s32.totalorder (%p1493_p0), %s621_s5, 8 }
  0x63   : > { %820 = vmatprep.subr.mxu0 %v255_v2  ;;  %v244_v14 = vld [vmem:[#allocation5 + $0x10] sm:$0xff]  ;;  %v243_v15 = vld [vmem:[#allocation5 + $0x8] sm:$0xff]  ;;  %v242_v16 = vld [vmem:[#allocation5] sm:$0xff] }
  0x64   : > { %821 = vmatpush3.msra.mxu0 %v255_v2  ;;  %v1370_v17 = vld [vmem:[%s1355_s19 + $0x8] sm:$0xff]  ;;  %v1373_v18 = vld [vmem:[%s1355_s19 + $0x10] sm:$0xff]  ;;  %v1378_v19 = vld [vmem:[%s1355_s19 + $0x18] sm:$0xff] }
  0x65   : > { %822 = vmatprep.subr.mxu0 %v254_v3  ;;  %v1381_v20 = vld [vmem:[%s1355_s19 + $0x20] sm:$0xff]  ;;  %v1386_v21 = vld [vmem:[%s1355_s19 + $0x28] sm:$0xff]  ;;  %v1389_v22 = vld [vmem:[%s1355_s19 + $0x30] sm:$0xff] }
  0x66   : > { %823 = vmatpush3.msra.mxu0 %v254_v3  ;;  %v1394_v23 = vld [vmem:[%s1355_s19 + $0x38] sm:$0xff]  ;;  %v433_v25 = vld [vmem:[#allocation7 + $0x70] sm:$0xff]  ;;  %v432_v26 = vld [vmem:[#allocation7 + $0x68] sm:$0xff] }
  0x67   : > { %824 = vmatprep.subr.mxu0 %v253_v5  ;;  %v434_v24 = vld [vmem:[#allocation7 + $0x78] sm:$0xff]  ;;  %v431_v27 = vld [vmem:[#allocation7 + $0x60] sm:$0xff]  ;;  %v429_v29 = vld [vmem:[#allocation7 + $0x50] sm:$0xff] }
  0x68   : > { %825 = vmatpush3.msra.mxu0 %v253_v5  ;;  %860 = vmatprep.subr.mxu1 %v434_v24  ;;  %v430_v28 = vld [vmem:[#allocation7 + $0x58] sm:$0xff]  ;;  %v428_v30 = vld [vmem:[#allocation7 + $0x48] sm:$0xff]  ;;  %v427_v31 = vld [vmem:[#allocation7 + $0x40] sm:$0xff] }
  0x69   : > { %826 = vmatprep.subr.mxu0 %v252_v6  ;;  %861 = vmatpush3.msra.mxu1 %v434_v24  ;;  %v426_v32 = vld [vmem:[#allocation7 + $0x38] sm:$0xff]  ;;  %v425_v33 = vld [vmem:[#allocation7 + $0x30] sm:$0xff]  ;;  %v424_v34 = vld [vmem:[#allocation7 + $0x28] sm:$0xff] }
  0x6a   : > { %827 = vmatpush3.msra.mxu0 %v252_v6  ;;  %862 = vmatprep.subr.mxu1 %v433_v25  ;;  %v423_v35 = vld [vmem:[#allocation7 + $0x20] sm:$0xff]  ;;  %v422_v36 = vld [vmem:[#allocation7 + $0x18] sm:$0xff]  ;;  %v421_v37 = vld [vmem:[#allocation7 + $0x10] sm:$0xff] }
  0x6b   : > { %828 = vmatprep.subr.mxu0 %v251_v7  ;;  %863 = vmatpush3.msra.mxu1 %v433_v25  ;;  %v420_v38 = vld [vmem:[#allocation7 + $0x8] sm:$0xff]  ;;  %v419_v39 = vld [vmem:[#allocation7] sm:$0xff] }
  0x6c   : > { %829 = vmatpush3.msra.mxu0 %v251_v7  ;;  %864 = vmatprep.subr.mxu1 %v432_v26 }
  0x6d   : > { %830 = vmatprep.subr.mxu0 %v250_v8  ;;  %865 = vmatpush3.msra.mxu1 %v432_v26 }
  0x6e   : > { %831 = vmatpush3.msra.mxu0 %v250_v8  ;;  %866 = vmatprep.subr.mxu1 %v431_v27 }
  0x6f   : > { %832 = vmatprep.subr.mxu0 %v249_v9  ;;  %867 = vmatpush3.msra.mxu1 %v431_v27 }
  0x70   : > { %833 = vmatpush3.msra.mxu0 %v249_v9  ;;  %868 = vmatprep.subr.mxu1 %v430_v28 }
  0x71   : > { %834 = vmatprep.subr.mxu0 %v248_v10  ;;  %869 = vmatpush3.msra.mxu1 %v430_v28 }
  0x72   : > { %835 = vmatpush3.msra.mxu0 %v248_v10  ;;  %870 = vmatprep.subr.mxu1 %v429_v29 }
  0x73   : > { %836 = vmatprep.subr.mxu0 %v247_v11  ;;  %871 = vmatpush3.msra.mxu1 %v429_v29 }
  0x74   : > { %837 = vmatpush3.msra.mxu0 %v247_v11  ;;  %872 = vmatprep.subr.mxu1 %v428_v30 }
  0x75   : > { %838 = vmatprep.subr.mxu0 %v246_v12  ;;  %873 = vmatpush3.msra.mxu1 %v428_v30 }
  0x76   : > { %839 = vmatpush3.msra.mxu0 %v246_v12  ;;  %874 = vmatprep.subr.mxu1 %v427_v31 }
  0x77   : > { %840 = vmatprep.subr.mxu0 %v245_v13  ;;  %875 = vmatpush3.msra.mxu1 %v427_v31 }
  0x78   : > { %841 = vmatpush3.msra.mxu0 %v245_v13  ;;  %876 = vmatprep.subr.mxu1 %v426_v32 }
  0x79   : > { %842 = vmatprep.subr.mxu0 %v244_v14  ;;  %877 = vmatpush3.msra.mxu1 %v426_v32 }
  0x7a   : > { %843 = vmatpush3.msra.mxu0 %v244_v14  ;;  %878 = vmatprep.subr.mxu1 %v425_v33 }
  0x7b   : > { %844 = vmatprep.subr.mxu0 %v243_v15  ;;  %879 = vmatpush3.msra.mxu1 %v425_v33 }
  0x7c   : > { %845 = vmatpush3.msra.mxu0 %v243_v15  ;;  %880 = vmatprep.subr.mxu1 %v424_v34 }
  0x7d   : > { %846 = vmatprep.subr.mxu0 %v242_v16  ;;  %881 = vmatpush3.msra.mxu1 %v424_v34 }
  0x7e   : > { %847 = vmatpush3.msra.mxu0 %v242_v16  ;;  %882 = vmatprep.subr.mxu1 %v423_v35 }
  0x7f   : > { %849 = vmatmul.mubr.f32.vlgmr.msra.gmra.mxu0 %v1370_v17  ;;  %883 = vmatpush3.msra.mxu1 %v423_v35 }
  0x80   : > { %851 = vmatprep.mubr.f32.mxu0 %v1373_v18  ;;  %884 = vmatprep.subr.mxu1 %v422_v36 }
  0x81   : > { %885 = vmatpush3.msra.mxu1 %v422_v36 }
  0x82   : > { %886 = vmatprep.subr.mxu1 %v421_v37 }
  0x83   : > { %852 = vmatmul.mubr.f32.gmra.mxu0 %v1378_v19  ;;  %887 = vmatpush3.msra.mxu1 %v421_v37 }
  0x84   : > { %854 = vmatprep.mubr.f32.mxu0 %v1381_v20  ;;  %888 = vmatprep.subr.mxu1 %v420_v38 }
  0x85   : > { %889 = vmatpush3.msra.mxu1 %v420_v38 }
  0x86   : > { %890 = vmatprep.subr.mxu1 %v419_v39 }
  0x87   : > { %855 = vmatmul.mubr.f32.gmra.mxu0 %v1386_v21  ;;  %891 = vmatpush3.msra.mxu1 %v419_v39 }
  0x88   : > { %857 = vmatprep.mubr.f32.mxu0 %v1389_v22 }
  0x8b   : > { %858 = vmatmul.mubr.f32.gmra.mxu0 %v1394_v23 }
 0x13f   : > { %v850_v40 = vpop.f32.mrf.mxu0 }
 0x140   : > { %v742_v41 = vmul.f32 -1.442695, %v850_v40 }
 0x141   : > { %v324_v42 = vpop.f32.mrf.mxu0 }
 0x142   : > { %970 = vpow2.f32 %v742_v41  ;;  %v741_v43 = vmul.f32 -1.442695, %v324_v42 }
 0x143   : > { %v853_v44 = vpop.f32.mrf.mxu0 }
 0x144   : > { %972 = vpow2.f32 %v741_v43  ;;  %v744_v45 = vmul.f32 -1.442695, %v853_v44 }
 0x145   : > { %v334_v46 = vpop.f32.mrf.mxu0 }
 0x146   : > { %974 = vpow2.f32 %v744_v45  ;;  %v743_v47 = vmul.f32 -1.442695, %v334_v46 }
 0x147   : > { %v856_v48 = vpop.f32.mrf.mxu0 }
 0x148   : > { %976 = vpow2.f32 %v743_v47  ;;  %v746_v49 = vmul.f32 -1.442695, %v856_v48 }
 0x149   : > { %v344_v50 = vpop.f32.mrf.mxu0 }
 0x14a   : > { %978 = vpow2.f32 %v746_v49  ;;  %v745_v51 = vmul.f32 -1.442695, %v344_v50 }
 0x14b   : > { %v859_v52 = vpop.f32.mrf.mxu0 }
 0x14c   : > { %980 = vpow2.f32 %v745_v51  ;;  %v748_v53 = vmul.f32 -1.442695, %v859_v52 }
 0x14d   : > { %v354_v54 = vpop.f32.mrf.mxu0 }
 0x14e   : > { %982 = vpow2.f32 %v748_v53  ;;  %v747_v55 = vmul.f32 -1.442695, %v354_v54 }
 0x14f   : > { %v971_v56 = vpop.eup %970 }
 0x150   : > { %v388_v57 = vadd.f32 1.0, %v971_v56  ;;  %984 = vpow2.f32 %v747_v55 }
 0x151   : > { %v973_v58 = vpop.eup %972 }
 0x152   : > { %v387_v59 = vadd.f32 1.0, %v973_v58  ;;  %986 = vrcp.f32 %v388_v57 }
 0x153   : > { %v975_v60 = vpop.eup %974 }
 0x154   : > { %988 = vrcp.f32 %v387_v59  ;;  %v390_v61 = vadd.f32 1.0, %v975_v60 }
 0x155   : > { %v977_v62 = vpop.eup %976 }
 0x156   : > { %v389_v63 = vadd.f32 1.0, %v977_v62  ;;  %990 = vrcp.f32 %v390_v61 }
 0x157   : > { %v979_v0 = vpop.eup %978 }
 0x158   : > { %992 = vrcp.f32 %v389_v63  ;;  %v392_v1 = vadd.f32 1.0, %v979_v0 }
 0x159   : > { %v981_v2 = vpop.eup %980 }
 0x15a   : > { %v391_v3 = vadd.f32 1.0, %v981_v2  ;;  %994 = vrcp.f32 %v392_v1 }
 0x15b   : > { %v983_v5 = vpop.eup %982 }
 0x15c   : > { %996 = vrcp.f32 %v391_v3  ;;  %v394_v6 = vadd.f32 1.0, %v983_v5 }
 0x15d   : > { %v985_v7 = vpop.eup %984 }
 0x15e   : > { %v393_v8 = vadd.f32 1.0, %v985_v7  ;;  %998 = vrcp.f32 %v394_v6 }
 0x15f   : > { %v987_v9 = vpop.eup %986 }
 0x160   : > { %1000 = vrcp.f32 %v393_v8  ;;  %v412_v12 = vmul.f32 %v987_v9, %v850_v40 }
 0x161   : > { %v989_v10 = vpop.eup %988 }
 0x162   : > { %v411_v11 = vmul.f32 %v989_v10, %v324_v42 }
 0x163   : > { %v991_v13 = vpop.eup %990 }
 0x164   : > { %892 = vmatprep.mubr.f32.mxu1 %v411_v11  ;;  %v414_v16 = vmul.f32 %v991_v13, %v853_v44 }
 0x165   : > { %v993_v14 = vpop.eup %992  ;;  %893 = vmatmul.mubr.f32.vlgmr.msra.gmra.mxu1 %v412_v12 }
 0x166   : > { %v413_v15 = vmul.f32 %v993_v14, %v334_v46 }
 0x167   : > { %v995_v24 = vpop.eup %994 }
 0x168   : > { %895 = vmatprep.mubr.f32.mxu1 %v413_v15  ;;  %v416_v27 = vmul.f32 %v995_v24, %v856_v48 }
 0x169   : > { %v997_v25 = vpop.eup %996  ;;  %896 = vmatmul.mubr.f32.gmra.mxu1 %v414_v16 }
 0x16a   : > { %v415_v26 = vmul.f32 %v997_v25, %v344_v50 }
 0x16b   : > { %v999_v28 = vpop.eup %998 }
 0x16c   : > { %898 = vmatprep.mubr.f32.mxu1 %v415_v26  ;;  %v418_v31 = vmul.f32 %v999_v28, %v859_v52 }
 0x16d   : > { %v1001_v29 = vpop.eup %1000  ;;  %899 = vmatmul.mubr.f32.gmra.mxu1 %v416_v27 }
 0x16e   : > { %v417_v30 = vmul.f32 %v1001_v29, %v354_v54 }
 0x170   : > { %901 = vmatprep.mubr.f32.mxu1 %v417_v30 }
 0x171   : > { %902 = vmatmul.mubr.f32.gmra.mxu1 %v418_v31 }
 0x225   : > { %v894_v32 = vpop.f32.mrf.mxu1 }
 0x226   : > { %v750_v33 = vmul.f32 -1.442695, %v894_v32 }
 0x227   : > { %v501_v34 = vpop.f32.mrf.mxu1 }
 0x228   : > { %1002 = vpow2.f32 %v750_v33  ;;  %v749_v35 = vmul.f32 -1.442695, %v501_v34 }
 0x229   : > { %v897_v36 = vpop.f32.mrf.mxu1 }
 0x22a   : > { %1004 = vpow2.f32 %v749_v35  ;;  %v752_v37 = vmul.f32 -1.442695, %v897_v36 }
 0x22b   : > { %v511_v38 = vpop.f32.mrf.mxu1 }
 0x22c   : > { %1006 = vpow2.f32 %v752_v37  ;;  %v751_v39 = vmul.f32 -1.442695, %v511_v38 }
 0x22d   : > { %v900_v40 = vpop.f32.mrf.mxu1 }
 0x22e   : > { %1008 = vpow2.f32 %v751_v39  ;;  %v754_v41 = vmul.f32 -1.442695, %v900_v40 }
 0x22f   : > { %v521_v42 = vpop.f32.mrf.mxu1 }
 0x230   : > { %1010 = vpow2.f32 %v754_v41  ;;  %v753_v43 = vmul.f32 -1.442695, %v521_v42 }
 0x231   : > { %v903_v44 = vpop.f32.mrf.mxu1 }
 0x232   : > { %1012 = vpow2.f32 %v753_v43  ;;  %v756_v45 = vmul.f32 -1.442695, %v903_v44 }
 0x233   : > { %v531_v46 = vpop.f32.mrf.mxu1 }
 0x234   : > { %1014 = vpow2.f32 %v756_v45  ;;  %v755_v47 = vmul.f32 -1.442695, %v531_v46 }
 0x235   : > { %v1003_v48 = vpop.eup %1002 }
 0x236   : > { %v565_v49 = vadd.f32 1.0, %v1003_v48  ;;  %1016 = vpow2.f32 %v755_v47 }
 0x237   : > { %v1005_v50 = vpop.eup %1004 }
 0x238   : > { %1018 = vrcp.f32 %v565_v49  ;;  %v564_v51 = vadd.f32 1.0, %v1005_v50 }
 0x239   : > { %v1007_v52 = vpop.eup %1006 }
 0x23a   : > { %1020 = vrcp.f32 %v564_v51  ;;  %v567_v53 = vadd.f32 1.0, %v1007_v52 }
 0x23b   : > { %v1009_v54 = vpop.eup %1008 }
 0x23c   : > { %1022 = vrcp.f32 %v567_v53  ;;  %v566_v55 = vadd.f32 1.0, %v1009_v54 }
 0x23d   : > { %v1011_v56 = vpop.eup %1010 }
 0x23e   : > { %1024 = vrcp.f32 %v566_v55  ;;  %v569_v57 = vadd.f32 1.0, %v1011_v56 }
 0x23f   : > { %v1013_v58 = vpop.eup %1012 }
 0x240   : > { %1026 = vrcp.f32 %v569_v57  ;;  %v568_v59 = vadd.f32 1.0, %v1013_v58 }
 0x241   : > { %v1015_v60 = vpop.eup %1014 }
 0x242   : > { %1028 = vrcp.f32 %v568_v59  ;;  %v571_v61 = vadd.f32 1.0, %v1015_v60 }
 0x243   : > { %v1017_v62 = vpop.eup %1016 }
 0x244   : > { %1030 = vrcp.f32 %v571_v61  ;;  %v570_v63 = vadd.f32 1.0, %v1017_v62 }
 0x245   : > { %v1019_v0 = vpop.eup %1018 }
 0x246   : > { %v589_v1 = vmul.f32 %v1019_v0, %v894_v32  ;;  %1032 = vrcp.f32 %v570_v63 }
 0x247   : > { %v1021_v2 = vpop.eup %1020 }
 0x248   : > { %v597_v3 = vadd.f32 %v589_v1, %v1370_v17  ;;  %v588_v5 = vmul.f32 %v1021_v2, %v501_v34 }
 0x249   : > { %v1023_v6 = vpop.eup %1022 }
 0x24a   : > { %605 = vst [vmem:[%s1400_s23 + $0x8] sm:$0xff] %v597_v3  ;;  %v596_v7 = vadd.f32 %v588_v5, %v1366_v4  ;;  %v591_v8 = vmul.f32 %v1023_v6, %v897_v36 }
 0x24b   : > { %v1025_v9 = vpop.eup %1024 }
 0x24c   : > { %604 = vst [vmem:[%s1400_s23] sm:$0xff] %v596_v7  ;;  %v599_v10 = vadd.f32 %v591_v8, %v1378_v19  ;;  %v590_v17 = vmul.f32 %v1025_v9, %v511_v38 }
 0x24d   : > { %v1027_v11 = vpop.eup %1026 }
 0x24e   : > { %607 = vst [vmem:[%s1400_s23 + $0x18] sm:$0xff] %v599_v10  ;;  %v598_v12 = vadd.f32 %v590_v17, %v1373_v18  ;;  %v593_v13 = vmul.f32 %v1027_v11, %v900_v40 }
 0x24f   : > { %v1029_v14 = vpop.eup %1028 }
 0x250   : > { %606 = vst [vmem:[%s1400_s23 + $0x10] sm:$0xff] %v598_v12  ;;  %v601_v15 = vadd.f32 %v593_v13, %v1386_v21  ;;  %v592_v4 = vmul.f32 %v1029_v14, %v521_v42 }
 0x251   : > { %v1031_v16 = vpop.eup %1030 }
 0x252   : > { %609 = vst [vmem:[%s1400_s23 + $0x28] sm:$0xff] %v601_v15  ;;  %v600_v24 = vadd.f32 %v592_v4, %v1381_v20  ;;  %v595_v25 = vmul.f32 %v1031_v16, %v903_v44 }
 0x253   : > { %v1033_v19 = vpop.eup %1032 }
 0x254   : > { %608 = vst [vmem:[%s1400_s23 + $0x20] sm:$0xff] %v600_v24  ;;  %v603_v26 = vadd.f32 %v595_v25, %v1394_v23  ;;  %v594_v27 = vmul.f32 %v1033_v19, %v531_v46  ;;  %619 = sbr.rel (!%p1493_p0) target bundleno = 628 (0x274), region = 48 }
 0x256   : > { %611 = vst [vmem:[%s1400_s23 + $0x38] sm:$0xff] %v603_v26  ;;  %v602_v18 = vadd.f32 %v594_v27, %v1389_v22 }
 0x258   : > { %610 = vst [vmem:[%s1400_s23 + $0x30] sm:$0xff] %v602_v18 }
 0x259   : > { %s1502_s5 = smov (!%p622_p10, %s621_s5), 8 }
 0x25a   : > { %s1421_s8 = sshll.u32 %s1502_s5, 7 }
 0x25b   : > { %s626_s9 = ssub.s32 1024, %s1421_s8 }
 0x25c   : > { %627 = vsyncadd %s613_s26, %s626_s9  ;;  %p760_p1 = scmp.ne.s32.totalorder %s1421_s8, 0  ;;  %s767_s24 = sshll.u32 %s1233_s16, 10 }
 0x25d   : > { %s1431_s28 = scalar_lea.hbm %s1481_s3, %s767_s24  ;;  %s632_s29 = sshll.u32 %s1400_s23, 4  ;;  %s1434_s29 = int_to_ptr.vmem [resolvable:$true] %s632_s29 }
 0x25e   : > { %s1112_s4 = scalar_lea.vmem %s1434_s29, %s1421_s8  ;;  %s1189_s22 = smov [#allocation8]  }
 0x25f   : > { %p1113_p3 = scmp.ne.s32.totalorder %s1434_s29, %s1112_s4  ;;  %s1116_s6 = sshll.u32 %s1189_s22, 4  ;;  %s1117_s6 = int_to_ptr.vmem [resolvable:$false] %s1116_s6 }
 0x260   : > { %s1118_s16 = scalar_lea.vmem %s1117_s6, 2048  ;;  %p1119_p12 = scmp.lt.s32.totalorder %s1434_s29, %s1117_s6 }
 0x261   : > { %p1114_p7 = pnand %p1113_p3, %p760_p1  ;;  %p1120_p8 = scmp.lt.s32.totalorder %s1118_s16, %s1112_s4 }
 0x263   : > { %p1115_p9 = pneg %p1114_p7  ;;  %p1121_p4 = por %p1120_p8, %p1119_p12 }
 0x265   : > { %p1122_p6 = pnand %p1121_p4, %p1115_p9 }
 0x267   : > { %1125 = shalt.err (!%p1122_p6)
}
 0x268   : > { %s1126_s7 = scalar_lea.hbm %s1431_s28, %s1421_s8  ;;  %s1130_s19 = scalar_lea.hbm %s1481_s3, 3200 }
 0x269   : > { %p1127_p11 = scmp.ne.s32.totalorder %s1431_s28, %s1126_s7  ;;  %p1131_p13 = scmp.lt.s32.totalorder %s1431_s28, %s1481_s3 }
 0x26a   : > { %p1132_p0 = scmp.lt.s32.totalorder %s1130_s19, %s1126_s7 }
 0x26b   : > { %p1128_p2 = pnand %p1127_p11, %p760_p1 }
 0x26c   : > { %p1133_p10 = por %p1132_p0, %p1131_p13 }
 0x26d   : > { %p1129_p5 = pneg %p1128_p2 }
 0x26f   : > { %p1134_p3 = pnand %p1133_p10, %p1129_p5 }
 0x271   : > { %1137 = shalt.err (!%p1134_p3)
}
 0x272   : > { %s1190_s5 = smov 128   ;;  %s1191_s9 = smov 8  }
 0x273   : > { %638 = dma.vmem_to_hbm [thread:$0]  (%p760_p1), %s1434_s29, %s1421_s8, %s1431_s28, %s613_s26, %s1190_s5, %s1190_s5, %s1191_s9  }
 0x274 PF: > { %p929_p7 = scmp.ge.s32.totalorder %s1180_s15, 2  ;;  %s647_s24 = sand.u32 1, %s1168_s12  }
 0x275   : > { %p1494_p9 = scmp.ne.s32.totalorder %s1487_s25, 0  ;;  %s648_s20 = scalar_lea.sflag [#allocation4], %s647_s24 }
 0x277   : > { %p922_p12 = pnand %p929_p7, %p1494_p9 }
 0x279   : > { %p923_p8 = pneg %p922_p12 }
 0x27b   : > { %1163 = dma.done.wait (%p923_p8), %s648_s20, 1024  }
 0x27c   : > { %1165 = vsyncadd (%p923_p8), %s648_s20, 4294966272  ;;  %p17_p4 = scmp.ge.s32.totalorder %s1237_s18, 6   ;;  %s1495_s12 = smov %s1172_s13 }
 0x27d   : > { %s1496_s13 = smov %s1176_s14  ;;  %s1497_s14 = smov %s1249_s21 }
 0x27e   : > { %s1498_s15 = smov %s1237_s18  ;;  %19 = sbr.rel (!%p17_p4) target bundleno = 6 (0x6), region = 85 }
 0x283   :  { %653 = vsyncpa [#allocation3], 1 }
 0x284   :  { %655 = vsyncpa [#allocation3 + $0x1], 1 }
 0x285   :  { %656 = vsyncpa [#allocation6], 1 }
 0x286   :  { %657 = vsyncpa [#allocation4], 1 }
 0x287   :  { %659 = vsyncpa [#allocation4 + $0x1], 1 }

</bundles_post_ra>
